<compile_context>
chip_gen: v6e
topology: v6e:2x2x1
jax: 0.10.0
libtpu: 0.0.40
codegen_flags: <defaults>
</compile_context>

<pallas_src>
import functools
import math

import jax
import jax.numpy as jnp
from jax import lax
from jax.experimental import pallas as pl
from jax.experimental.pallas import tpu as pltpu

VMEM_LIMIT = 32 * 1024 * 1024  # safe on v5e/v6e/v7x; well above what our tiles need


def _pick_tile(s, cap):
    """Largest tile <= cap that divides s and is a multiple of 8; else full s."""
    if s <= cap:
        return s
    for t in range(cap, 7, -1):
        if s % t == 0 and t % 8 == 0:
            return t
    return s


# ---------------------------------------------------------------------------
# Kernel 1: GroupNorm statistics -> per-channel scale/shift (folding gamma/beta)
# grid = (N, S // TS), S axis is an "arbitrary" reduction with VMEM accumulators.
# ---------------------------------------------------------------------------
def _gn_stats_kernel(x_ref, gamma_ref, beta_ref, m_ref, mt_ref, out_ref,
                     sum_sc, sumsq_sc, *, eps, denom):
    si = pl.program_id(1)

    @pl.when(si == 0)
    def _():
        sum_sc[...] = jnp.zeros_like(sum_sc)
        sumsq_sc[...] = jnp.zeros_like(sumsq_sc)

    x = x_ref[0]                                                   # (TS, C) f32
    sum_sc[...] += jnp.sum(x, axis=0, keepdims=True)               # (1, C)
    sumsq_sc[...] += jnp.sum(x * x, axis=0, keepdims=True)         # (1, C)

    @pl.when(si == pl.num_programs(1) - 1)
    def _():
        inv = 1.0 / denom
        m = m_ref[...]                                             # (C, G) one-hot
        g_mean = jnp.dot(sum_sc[...], m, preferred_element_type=jnp.float32) * inv
        g_msq = jnp.dot(sumsq_sc[...], m, preferred_element_type=jnp.float32) * inv
        # E[x^2]-E[x]^2 in f32, clamped to guard against cancellation.
        g_var = jnp.maximum(g_msq - g_mean * g_mean, 0.0)          # (1, G)
        g_rstd = lax.rsqrt(g_var + eps)
        # back-project group stats to channels with the precomputed transposed one-hot
        mean_c = jnp.dot(g_mean, mt_ref[...], preferred_element_type=jnp.float32)
        rstd_c = jnp.dot(g_rstd, mt_ref[...], preferred_element_type=jnp.float32)
        scale_c = gamma_ref[...] * rstd_c                          # (1, C)
        shift_c = beta_ref[...] - mean_c * scale_c                 # (1, C)
        out_ref[0] = jnp.concatenate([scale_c, shift_c], axis=0)   # (2, C)


# ---------------------------------------------------------------------------
# Kernel 2: normalize + fused QKV projection (bf16 MXU, f32 accumulation).
# The 1/sqrt(C) attention scale is folded into q here (cheaper than per score tile).
# ---------------------------------------------------------------------------
def _qkv_kernel(x_ref, ss_ref, wqkv_ref, bqkv_ref, q_ref, k_ref, v_ref,
                *, inv_sqrt_c):
    x = x_ref[0]                                  # (TS, C) f32
    ss = ss_ref[0]                                # (2, C)  f32
    xn = x * ss[0:1, :] + ss[1:2, :]              # GroupNorm affine in f32
    xn = xn.astype(wqkv_ref.dtype)                # bf16 MXU operand
    qkv = jnp.dot(xn, wqkv_ref[...],
                  preferred_element_type=jnp.float32) + bqkv_ref[...]   # (TS, 3C) f32
    C = x.shape[1]
    q_ref[0] = (qkv[:, 0:C] * inv_sqrt_c).astype(q_ref.dtype)
    k_ref[0] = qkv[:, C:2 * C].astype(k_ref.dtype)
    v_ref[0] = qkv[:, 2 * C:3 * C].astype(v_ref.dtype)


# ---------------------------------------------------------------------------
# Kernel 3: flash-style attention + output projection + residual.
# grid = (N, S // TQ, S // TK); K/V axis is the online-softmax reduction.
# ---------------------------------------------------------------------------
def _flash_attn_kernel(q_ref, k_ref, v_ref, x_ref, wo_ref, bo_ref, o_ref,
                       m_sc, l_sc, acc_sc):
    ki = pl.program_id(2)

    @pl.when(ki == 0)
    def _():
        m_sc[...] = jnp.full_like(m_sc, -jnp.inf)
        l_sc[...] = jnp.zeros_like(l_sc)
        acc_sc[...] = jnp.zeros_like(acc_sc)

    q = q_ref[0]                                  # (TQ, C) bf16 (pre-scaled)
    k = k_ref[0]                                  # (TK, C) bf16
    v = v_ref[0]                                  # (TK, C) bf16

    # contract last dims directly — no k.T materialization
    s = lax.dot_general(q, k, (((1,), (1,)), ((), ())),
                        preferred_element_type=jnp.float32)        # (TQ, TK) f32

    m_prev = m_sc[...]
    m_new = jnp.maximum(m_prev, jnp.max(s, axis=-1, keepdims=True))
    alpha = jnp.exp(m_prev - m_new)
    p = jnp.exp(s - m_new)                                          # f32
    l_sc[...] = alpha * l_sc[...] + jnp.sum(p, axis=-1, keepdims=True)
    acc_sc[...] = alpha * acc_sc[...] + jnp.dot(
        p.astype(v.dtype), v, preferred_element_type=jnp.float32)
    m_sc[...] = m_new

    @pl.when(ki == pl.num_programs(2) - 1)
    def _():
        attn = acc_sc[...] * pl.reciprocal(l_sc[...], approx=True)
        out = jnp.dot(attn.astype(wo_ref.dtype), wo_ref[...],
                      preferred_element_type=jnp.float32) + bo_ref[...]
        o_ref[0] = (out + x_ref[0]).astype(o_ref.dtype)             # residual in f32


def vae_attention_block(x_nchw, params, *, n_groups=32, eps=1e-5,
                        compute_dtype=jnp.bfloat16):
    """x_nchw: (N, C, H, W) float32. Returns (N, C, H, W) float32."""
    N, C, H, W = x_nchw.shape
    S = H * W
    G = n_groups
    assert C % G == 0, "GroupNorm requires channels divisible by num_groups"

    # NCHW -> (N, S, C) channels-last.
    # TODO(synk): accept/produce channels-last activations at the module boundary
    # to avoid these extra HBM layout passes.
    x_nsc = jnp.transpose(x_nchw.reshape(N, C, S), (0, 2, 1)).astype(jnp.float32)

    # group one-hot and its transpose (precomputed: no in-kernel transposes)
    m = (jnp.arange(C)[:, None] // (C // G) == jnp.arange(G)[None, :]).astype(jnp.float32)
    mt = m.T

    gamma = params["gamma"].reshape(1, C).astype(jnp.float32)
    beta = params["beta"].reshape(1, C).astype(jnp.float32)
    wqkv = jnp.concatenate(
        [params["wq"], params["wk"], params["wv"]], axis=1).astype(compute_dtype)
    bqkv = jnp.concatenate(
        [params["bq"], params["bk"], params["bv"]]).reshape(1, 3 * C).astype(jnp.float32)
    wo = params["wo"].astype(compute_dtype)
    bo = params["bo"].reshape(1, C).astype(jnp.float32)

    # ---------------- pass 1: GroupNorm stats -> (scale, shift) ----------------
    ts_stats = _pick_tile(S, 1024)
    scale_shift = pl.pallas_call(
        functools.partial(_gn_stats_kernel, eps=eps, denom=float(S * (C // G))),
        out_shape=jax.ShapeDtypeStruct((N, 2, C), jnp.float32),
        grid_spec=pltpu.PrefetchScalarGridSpec(
            num_scalar_prefetch=0,
            grid=(N, S // ts_stats),
            in_specs=[
                pl.BlockSpec((1, ts_stats, C), lambda b, s: (b, s, 0)),  # x
                pl.BlockSpec((1, C), lambda b, s: (0, 0)),               # gamma
                pl.BlockSpec((1, C), lambda b, s: (0, 0)),               # beta
                pl.BlockSpec((C, G), lambda b, s: (0, 0)),               # one-hot
                pl.BlockSpec((G, C), lambda b, s: (0, 0)),               # one-hot^T
            ],
            out_specs=pl.BlockSpec((1, 2, C), lambda b, s: (b, 0, 0)),
            scratch_shapes=[pltpu.VMEM((1, C), jnp.float32),
                            pltpu.VMEM((1, C), jnp.float32)],
        ),
        compiler_params=pltpu.CompilerParams(
            dimension_semantics=("parallel", "arbitrary"),
            vmem_limit_bytes=VMEM_LIMIT),
    )(x_nsc, gamma, beta, m, mt)

    # ---------------- pass 2: normalize + fused QKV projection ----------------
    ts = _pick_tile(S, 512)
    qkv_shape = jax.ShapeDtypeStruct((N, S, C), compute_dtype)
    q, k, v = pl.pallas_call(
        functools.partial(_qkv_kernel, inv_sqrt_c=1.0 / math.sqrt(C)),
        out_shape=(qkv_shape, qkv_shape, qkv_shape),
        grid_spec=pltpu.PrefetchScalarGridSpec(
            num_scalar_prefetch=0,
            grid=(N, S // ts),
            in_specs=[
                pl.BlockSpec((1, ts, C), lambda b, s: (b, s, 0)),        # x
                pl.BlockSpec((1, 2, C), lambda b, s: (b, 0, 0)),         # scale/shift
                pl.BlockSpec((C, 3 * C), lambda b, s: (0, 0)),           # wqkv
                pl.BlockSpec((1, 3 * C), lambda b, s: (0, 0)),           # bqkv
            ],
            out_specs=[pl.BlockSpec((1, ts, C), lambda b, s: (b, s, 0))] * 3,
        ),
        compiler_params=pltpu.CompilerParams(
            dimension_semantics=("parallel", "parallel"),
            vmem_limit_bytes=VMEM_LIMIT),
    )(x_nsc, scale_shift, wqkv, bqkv)

    # ---------------- pass 3: flash attention + out proj + residual ----------------
    tq = _pick_tile(S, 512)
    tk = _pick_tile(S, 512)
    flops = int(N * (4 * S * S * C + 2 * S * C * C))
    out_nsc = pl.pallas_call(
        _flash_attn_kernel,
        out_shape=jax.ShapeDtypeStruct((N, S, C), jnp.float32),
        grid_spec=pltpu.PrefetchScalarGridSpec(
            num_scalar_prefetch=0,
            grid=(N, S // tq, S // tk),
            in_specs=[
                pl.BlockSpec((1, tq, C), lambda b, qi, ki: (b, qi, 0)),  # q
                pl.BlockSpec((1, tk, C), lambda b, qi, ki: (b, ki, 0)),  # k
                pl.BlockSpec((1, tk, C), lambda b, qi, ki: (b, ki, 0)),  # v
                pl.BlockSpec((1, tq, C), lambda b, qi, ki: (b, qi, 0)),  # residual x
                pl.BlockSpec((C, C), lambda b, qi, ki: (0, 0)),          # wo
                pl.BlockSpec((1, C), lambda b, qi, ki: (0, 0)),          # bo
            ],
            out_specs=pl.BlockSpec((1, tq, C), lambda b, qi, ki: (b, qi, 0)),
            scratch_shapes=[pltpu.VMEM((tq, 1), jnp.float32),   # running max
                            pltpu.VMEM((tq, 1), jnp.float32),   # running sum
                            pltpu.VMEM((tq, C), jnp.float32)],  # output accumulator
        ),
        compiler_params=pltpu.CompilerParams(
            dimension_semantics=("parallel", "parallel", "arbitrary"),
            vmem_limit_bytes=VMEM_LIMIT),
        cost_estimate=pl.CostEstimate(
            flops=flops,
            transcendentals=int(N * S * S),
            bytes_accessed=int(N * S * C * (3 * 2 + 4 + 4))),
    )(q, k, v, x_nsc, wo, bo)

    # (N, S, C) -> NCHW
    return jnp.transpose(out_nsc, (0, 2, 1)).reshape(N, C, H, W)


def _reference_forward(x_nchw, params, *, n_groups=32, eps=1e-5):
    """Pure-JAX reference mirroring the PyTorch module semantics (f32)."""
    N, C, H, W = x_nchw.shape
    xg = x_nchw.reshape(N, n_groups, C // n_groups, H, W)
    mean = xg.mean(axis=(2, 3, 4), keepdims=True)
    var = xg.var(axis=(2, 3, 4), keepdims=True)
    xn = (xg - mean) / jnp.sqrt(var + eps)
    xn = xn.reshape(N, C, H, W)
    xn = xn * params["gamma"][None, :, None, None] + params["beta"][None, :, None, None]
    t = jnp.transpose(xn.reshape(N, C, H * W), (0, 2, 1))        # (N, S, C)
    q = t @ params["wq"] + params["bq"]
    k = t @ params["wk"] + params["bk"]
    v = t @ params["wv"] + params["bv"]
    s = jnp.einsum("nsc,ntc->nst", q, k) / math.sqrt(C)
    p = jax.nn.softmax(s, axis=-1)
    a = jnp.einsum("nst,ntc->nsc", p, v)
    o = a @ params["wo"] + params["bo"]
    o = jnp.transpose(o, (0, 2, 1)).reshape(N, C, H, W)
    return o + x_nchw


def _init_params(key, C):
    ks = jax.random.split(key, 6)
    scale = 0.05
    return {
        "gamma": 1.0 + 0.1 * jax.random.normal(ks[0], (C,), jnp.float32),
        "beta": 0.1 * jax.random.normal(ks[1], (C,), jnp.float32),
        "wq": scale * jax.random.normal(ks[2], (C, C), jnp.float32),
        "wk": scale * jax.random.normal(ks[3], (C, C), jnp.float32),
        "wv": scale * jax.random.normal(ks[4], (C, C), jnp.float32),
        "wo": scale * jax.random.normal(ks[5], (C, C), jnp.float32),
        "bq": jnp.zeros((C,), jnp.float32),
        "bk": jnp.full((C,), 0.01, jnp.float32),
        "bv": jnp.full((C,), -0.01, jnp.float32),
        "bo": jnp.full((C,), 0.02, jnp.float32),
    }


if __name__ == "__main__":
    key = jax.random.PRNGKey(0)
    kx, kp = jax.random.split(key)

    # GroupNorm(32, C) requires C % 32 == 0 -> smallest sensible C is 32.
    N, C, H, W = 2, 32, 8, 8
    x = jax.random.normal(kx, (N, C, H, W), jnp.float32)
    params = _init_params(kp, C)

    out = jax.block_until_ready(vae_attention_block(x, params))
    ref = _reference_forward(x, params)

    assert out.shape == (N, C, H, W)
    err = float(jnp.max(jnp.abs(out - ref)))
    # bf16 MXU operands with f32 accumulation -> looser tolerance than pure f32
    assert jnp.allclose(out, ref, rtol=3e-2, atol=3e-2), f"max abs err {err}"

    print("KERNEL_OK")
</pallas_src>

<mosaic_0001>
module attributes {stable_mosaic.version = 11 : i64} {
  func.func @_gn_stats_kernel(%arg0: i32, %arg1: i32, %arg2: memref<1x64x32xf32, #tpu.memory_space<vmem>>, %arg3: memref<1x32xf32, #tpu.memory_space<vmem>>, %arg4: memref<1x32xf32, #tpu.memory_space<vmem>>, %arg5: memref<32x32xf32, #tpu.memory_space<vmem>>, %arg6: memref<32x32xf32, #tpu.memory_space<vmem>>, %arg7: memref<1x2x32xf32, #tpu.memory_space<vmem>>, %arg8: memref<1x32xf32, #tpu.memory_space<vmem>>, %arg9: memref<1x32xf32, #tpu.memory_space<vmem>>) attributes {dimension_semantics = [#tpu.dimension_semantics<parallel>, #tpu.dimension_semantics<arbitrary>], iteration_bounds = array<i64: 2, 1>, scalar_prefetch = 0 : i64, scratch_operands = 2 : i64, tpu.core_type = #tpu.core_type<tc>, window_params = [{transform_indices = @transform_0, window_bounds = array<i64: 1, 64, 32>}, {pipeline_mode = #tpu.pipeline_mode<synchronous>, transform_indices = @transform_1, window_bounds = array<i64: 1, 32>}, {pipeline_mode = #tpu.pipeline_mode<synchronous>, transform_indices = @transform_2, window_bounds = array<i64: 1, 32>}, {pipeline_mode = #tpu.pipeline_mode<synchronous>, transform_indices = @transform_3, window_bounds = array<i64: 32, 32>}, {pipeline_mode = #tpu.pipeline_mode<synchronous>, transform_indices = @transform_4, window_bounds = array<i64: 32, 32>}, {transform_indices = @transform_5, window_bounds = array<i64: 1, 2, 32>}]} {
    %c0_i32 = arith.constant 0 : i32
    %0 = arith.cmpi eq, %arg1, %c0_i32 : i32
    %1 = arith.extui %0 : i1 to i32
    %c0_i32_0 = arith.constant 0 : i32
    %2 = arith.cmpi ne, %1, %c0_i32_0 : i32
    scf.if %2 {
      %cst_14 = arith.constant 0.000000e+00 : f32
      %19 = vector.broadcast %cst_14 : f32 to vector<1x32xf32>
      %c0_15 = arith.constant 0 : index
      %c0_16 = arith.constant 0 : index
      %20 = vector.load %arg8[%c0_15, %c0_16] : memref<1x32xf32, #tpu.memory_space<vmem>>, vector<1x32xf32>
      tpu.vector_store %arg8[%c0_15, %c0_16], %19 {strides = array<i32>} : memref<1x32xf32, #tpu.memory_space<vmem>>, vector<1x32xf32>,
      %cst_17 = arith.constant 0.000000e+00 : f32
      %21 = vector.broadcast %cst_17 : f32 to vector<1x32xf32>
      %c0_18 = arith.constant 0 : index
      %c0_19 = arith.constant 0 : index
      %22 = vector.load %arg9[%c0_18, %c0_19] : memref<1x32xf32, #tpu.memory_space<vmem>>, vector<1x32xf32>
      tpu.vector_store %arg9[%c0_18, %c0_19], %21 {strides = array<i32>} : memref<1x32xf32, #tpu.memory_space<vmem>>, vector<1x32xf32>,
    } else {
    }
    %c0 = arith.constant 0 : index
    %c0_1 = arith.constant 0 : index
    %c0_2 = arith.constant 0 : index
    %3 = vector.load %arg2[%c0, %c0_1, %c0_2] : memref<1x64x32xf32, #tpu.memory_space<vmem>>, vector<1x64x32xf32>
    %4 = vector.shape_cast %3 : vector<1x64x32xf32> to vector<64x32xf32>
    %c0_3 = arith.constant 0 : index
    %c0_4 = arith.constant 0 : index
    %5 = vector.load %arg8[%c0_3, %c0_4] : memref<1x32xf32, #tpu.memory_space<vmem>>, vector<1x32xf32>
    %cst = arith.constant dense<0.000000e+00> : vector<32xf32>
    %6 = vector.multi_reduction <add>, %4, %cst [0] : vector<64x32xf32> to vector<32xf32>
    %7 = vector.shape_cast %6 : vector<32xf32> to vector<1x32xf32>
    %8 = arith.addf %5, %7 : vector<1x32xf32>
    %c0_5 = arith.constant 0 : index
    %c0_6 = arith.constant 0 : index
    %9 = vector.load %arg8[%c0_5, %c0_6] : memref<1x32xf32, #tpu.memory_space<vmem>>, vector<1x32xf32>
    tpu.vector_store %arg8[%c0_5, %c0_6], %8 {strides = array<i32>} : memref<1x32xf32, #tpu.memory_space<vmem>>, vector<1x32xf32>,
    %c0_7 = arith.constant 0 : index
    %c0_8 = arith.constant 0 : index
    %10 = vector.load %arg9[%c0_7, %c0_8] : memref<1x32xf32, #tpu.memory_space<vmem>>, vector<1x32xf32>
    %11 = arith.mulf %4, %4 : vector<64x32xf32>
    %cst_9 = arith.constant dense<0.000000e+00> : vector<32xf32>
    %12 = vector.multi_reduction <add>, %11, %cst_9 [0] : vector<64x32xf32> to vector<32xf32>
    %13 = vector.shape_cast %12 : vector<32xf32> to vector<1x32xf32>
    %14 = arith.addf %10, %13 : vector<1x32xf32>
    %c0_10 = arith.constant 0 : index
    %c0_11 = arith.constant 0 : index
    %15 = vector.load %arg9[%c0_10, %c0_11] : memref<1x32xf32, #tpu.memory_space<vmem>>, vector<1x32xf32>
    tpu.vector_store %arg9[%c0_10, %c0_11], %14 {strides = array<i32>} : memref<1x32xf32, #tpu.memory_space<vmem>>, vector<1x32xf32>,
    %c0_i32_12 = arith.constant 0 : i32
    %16 = arith.cmpi eq, %arg1, %c0_i32_12 : i32
    %17 = arith.extui %16 : i1 to i32
    %c0_i32_13 = arith.constant 0 : i32
    %18 = arith.cmpi ne, %17, %c0_i32_13 : i32
    scf.if %18 {
      %c0_14 = arith.constant 0 : index
      %c0_15 = arith.constant 0 : index
      %19 = vector.load %arg5[%c0_14, %c0_15] : memref<32x32xf32, #tpu.memory_space<vmem>>, vector<32x32xf32>
      %c0_16 = arith.constant 0 : index
      %c0_17 = arith.constant 0 : index
      %20 = vector.load %arg8[%c0_16, %c0_17] : memref<1x32xf32, #tpu.memory_space<vmem>>, vector<1x32xf32>
      %cst_18 = arith.constant dense<0.000000e+00> : vector<1x32xf32>
      %21 = tpu.matmul %20, %19, %cst_18 {dimension_numbers = #tpu.dot_dimension_numbers<[1], [0], [0], [1], [0, 0, 1, 1], [], []>} : vector<1x32xf32>, vector<32x32xf32>, vector<1x32xf32> -> vector<1x32xf32>
      %cst_19 = arith.constant 1.562500e-02 : f32
      %22 = vector.broadcast %cst_19 : f32 to vector<1x32xf32>
      %23 = arith.mulf %21, %22 : vector<1x32xf32>
      %c0_20 = arith.constant 0 : index
      %c0_21 = arith.constant 0 : index
      %24 = vector.load %arg9[%c0_20, %c0_21] : memref<1x32xf32, #tpu.memory_space<vmem>>, vector<1x32xf32>
      %cst_22 = arith.constant dense<0.000000e+00> : vector<1x32xf32>
      %25 = tpu.matmul %24, %19, %cst_22 {dimension_numbers = #tpu.dot_dimension_numbers<[1], [0], [0], [1], [0, 0, 1, 1], [], []>} : vector<1x32xf32>, vector<32x32xf32>, vector<1x32xf32> -> vector<1x32xf32>
      %cst_23 = arith.constant 1.562500e-02 : f32
      %26 = vector.broadcast %cst_23 : f32 to vector<1x32xf32>
      %27 = arith.mulf %25, %26 : vector<1x32xf32>
      %28 = arith.mulf %23, %23 : vector<1x32xf32>
      %29 = arith.subf %27, %28 : vector<1x32xf32>
      %cst_24 = arith.constant 0.000000e+00 : f32
      %30 = vector.broadcast %cst_24 : f32 to vector<1x32xf32>
      %31 = arith.maximumf %29, %30 : vector<1x32xf32>
      %cst_25 = arith.constant 9.99999974E-6 : f32
      %32 = vector.broadcast %cst_25 : f32 to vector<1x32xf32>
      %33 = arith.addf %31, %32 : vector<1x32xf32>
      %34 = math.rsqrt %33 : vector<1x32xf32>
      %c0_26 = arith.constant 0 : index
      %c0_27 = arith.constant 0 : index
      %35 = vector.load %arg6[%c0_26, %c0_27] : memref<32x32xf32, #tpu.memory_space<vmem>>, vector<32x32xf32>
      %cst_28 = arith.constant dense<0.000000e+00> : vector<1x32xf32>
      %36 = tpu.matmul %23, %35, %cst_28 {dimension_numbers = #tpu.dot_dimension_numbers<[1], [0], [0], [1], [0, 0, 1, 1], [], []>} : vector<1x32xf32>, vector<32x32xf32>, vector<1x32xf32> -> vector<1x32xf32>
      %c0_29 = arith.constant 0 : index
      %c0_30 = arith.constant 0 : index
      %37 = vector.load %arg6[%c0_29, %c0_30] : memref<32x32xf32, #tpu.memory_space<vmem>>, vector<32x32xf32>
      %cst_31 = arith.constant dense<0.000000e+00> : vector<1x32xf32>
      %38 = tpu.matmul %34, %37, %cst_31 {dimension_numbers = #tpu.dot_dimension_numbers<[1], [0], [0], [1], [0, 0, 1, 1], [], []>} : vector<1x32xf32>, vector<32x32xf32>, vector<1x32xf32> -> vector<1x32xf32>
      %c0_32 = arith.constant 0 : index
      %c0_33 = arith.constant 0 : index
      %39 = vector.load %arg3[%c0_32, %c0_33] : memref<1x32xf32, #tpu.memory_space<vmem>>, vector<1x32xf32>
      %40 = arith.mulf %39, %38 : vector<1x32xf32>
      %c0_34 = arith.constant 0 : index
      %c0_35 = arith.constant 0 : index
      %41 = vector.load %arg4[%c0_34, %c0_35] : memref<1x32xf32, #tpu.memory_space<vmem>>, vector<1x32xf32>
      %42 = arith.mulf %36, %40 : vector<1x32xf32>
      %43 = arith.subf %41, %42 : vector<1x32xf32>
      %44 = tpu.concatenate %40, %43 in 0 : vector<1x32xf32>, vector<1x32xf32> -> vector<2x32xf32>
      %c0_36 = arith.constant 0 : index
      %c0_37 = arith.constant 0 : index
      %c0_38 = arith.constant 0 : index
      %45 = vector.load %arg7[%c0_36, %c0_37, %c0_38] : memref<1x2x32xf32, #tpu.memory_space<vmem>>, vector<1x2x32xf32>
      %46 = vector.shape_cast %45 : vector<1x2x32xf32> to vector<2x32xf32>
      %47 = vector.shape_cast %44 : vector<2x32xf32> to vector<1x2x32xf32>
      tpu.vector_store %arg7[%c0_36, %c0_37, %c0_38], %47 {strides = array<i32>} : memref<1x2x32xf32, #tpu.memory_space<vmem>>, vector<1x2x32xf32>,
    } else {
    }
    return
  }
  func.func @transform_0(%arg0: i32, %arg1: i32) -> (i32, i32, i32) {
    %c0_i32 = arith.constant 0 : i32
    %c0_i32_0 = arith.constant 0 : i32
    return %arg0, %arg1, %c0_i32 : i32, i32, i32
  }
  func.func @transform_1(%arg0: i32, %arg1: i32) -> (i32, i32) {
    %c0_i32 = arith.constant 0 : i32
    %c0_i32_0 = arith.constant 0 : i32
    %c0_i32_1 = arith.constant 0 : i32
    return %c0_i32, %c0_i32_0 : i32, i32
  }
  func.func @transform_2(%arg0: i32, %arg1: i32) -> (i32, i32) {
    %c0_i32 = arith.constant 0 : i32
    %c0_i32_0 = arith.constant 0 : i32
    %c0_i32_1 = arith.constant 0 : i32
    return %c0_i32, %c0_i32_0 : i32, i32
  }
  func.func @transform_3(%arg0: i32, %arg1: i32) -> (i32, i32) {
    %c0_i32 = arith.constant 0 : i32
    %c0_i32_0 = arith.constant 0 : i32
    %c0_i32_1 = arith.constant 0 : i32
    return %c0_i32, %c0_i32_0 : i32, i32
  }
  func.func @transform_4(%arg0: i32, %arg1: i32) -> (i32, i32) {
    %c0_i32 = arith.constant 0 : i32
    %c0_i32_0 = arith.constant 0 : i32
    %c0_i32_1 = arith.constant 0 : i32
    return %c0_i32, %c0_i32_0 : i32, i32
  }
  func.func @transform_5(%arg0: i32, %arg1: i32) -> (i32, i32, i32) {
    %c0_i32 = arith.constant 0 : i32
    %c0_i32_0 = arith.constant 0 : i32
    %c0_i32_1 = arith.constant 0 : i32
    return %arg0, %c0_i32, %c0_i32_0 : i32, i32, i32
  }
}

</mosaic_0001>

<bundles_post_ra>
// kernel: tpu_custom_call.1
= control target key start
LH: loop header
LB: loop body
LE: loop exit
PB: predicated region body
PF: predicated region fallthrough
CT: control target
= control target key end

     0   :  { %10 = vsyncpa [#allocation5], 0  ;;  %s1184_s0 = inlined_call_operand.vmem [shape: f32[2,64,32], index: 0, kind: input, shape index: {}]   ;;  %s1185_s1 = inlined_call_operand.vmem [shape: f32[1,32], index: 1, kind: input, shape index: {}]   ;;  %s1186_s2 = inlined_call_operand.vmem [shape: f32[1,32], index: 2, kind: input, shape index: {}]   ;;  %s1187_s3 = inlined_call_operand.vmem [shape: f32[32,32], index: 3, kind: input, shape index: {}]   ;;  %s1188_s4 = inlined_call_operand.vmem [shape: f32[32,32], index: 4, kind: input, shape index: {}]   ;;  %s1189_s5 = inlined_call_operand.hbm [shape: f32[2,2,32], index: 5, kind: output, shape index: {}]  }
   0x1   :  { %12 = vsyncpa [#allocation5 + $0x1], 0  ;;  %s989_s18 = smov 0   ;;  %s991_s19 = smov 0  }
   0x2   :  { %s993_s20 = smov 0   ;;  %s995_s21 = smov 0  }
   0x3   :  { %s997_s22 = smov 0   ;;  %s999_s23 = smov 0  }
   0x4 LB: > { %s738_s24 = sadd.s32 4294967295, %s954_s23   ;;  %s739_s25 = sadd.s32 4294967294, %s954_s23   ;;  %s954_s23 = sphi %s999_s23, %s18_s23   ;;  %s950_s22 = sphi %s997_s22, %s1196_s22   ;;  %s946_s21 = sphi %s995_s21, %s1195_s21   ;;  %s942_s20 = sphi %s993_s20, %s1194_s20   ;;  %s938_s19 = sphi %s991_s19, %s1193_s19   ;;  %s934_s18 = sphi %s989_s18, %s1192_s18  }
   0x5   : > { %s30_s26 = sadd.s32 1, %s950_s22  ;;  %s149_s27 = sadd.s32 1, %s942_s20 }
   0x6   : > { %p32_p0 = scmp.ge.s32.totalorder %s30_s26, 2  ;;  %p159_p1 = scmp.ne.s32.totalorder %s942_s20, %s938_s19 }
   0x7   : > { %p160_p2 = scmp.eq.s32.totalorder %s738_s24, 1  ;;  %p165_p3 = scmp.ne.s32.totalorder %s938_s19, %s934_s18 }
   0x8   : > { %s1198_s26 = smov (%p32_p0, %s30_s26), 0  ;;  %p166_p5 = scmp.eq.s32.totalorder %s739_s25, 1 }
   0x9   : > { %p1029_p4 = por %p160_p2, %p159_p1  ;;  %s146_s29 = ssub.s32 %s950_s22, %s1198_s26 }
   0xa   : > { %p742_p6 = scmp.ge.s32.totalorder %s954_s23, 1  ;;  %p147_p7 = scmp.eq.s32.totalorder %s146_s29, 0 }
   0xb   : > { %p1036_p8 = por %p166_p5, %p165_p3  ;;  %p209_p9 = scmp.lt.s32.totalorder %s954_s23, 3 }
   0xc   : > { %s1042_s6 = scalar_select %p147_p7, %s942_s20, %s149_s27  }
   0xd   : > { %p210_p10 = pnand %p742_p6, %p209_p9 }
   0xe   : > { %p242_p11 = scmp.lt.s32.totalorder (!%p210_p10), %s946_s21, 1  ;;  %s238_s13 = sand.u32 (!%p210_p10), 1, %s938_s19  }
   0xf   : > { %213 = sbr.rel (%p210_p10) target bundleno = 495 (0x1ef), region = 40  ;;  %s743_s16 = sshll.u32 (!%p210_p10), %s238_s13, 1 }
  0x10   : > { %s240_s27 = scalar_lea.vmem (!%p210_p10), [#allocation4], %s743_s16  ;;  %s652_s10 = scalar_lea.sflag (!%p210_p10), [#allocation5], %s238_s13 }
  0x11   : > { %s665_s29 = sshll.u32 (!%p210_p10), %s240_s27, 4  ;;  %s666_s29 = int_to_ptr.vmem [resolvable:$true] %s665_s29 }
  0x14   : > { %v330_v0 = vld [vmem:[%s1187_s3 + $0x18] sm:$0xff]  ;;  %v956_v1 = vmov 0.0   ;;  %v329_v2 = vld [vmem:[%s1187_s3 + $0x10] sm:$0xff]  ;;  %vm255_vm0 = vcmask 253952   ;;  %s243_s11 = scalar_select %p242_p11, %s946_s21, 1  ;;  %v328_v3 = vld [vmem:[%s1187_s3 + $0x8] sm:$0xff] }
  0x15   : > { %775 = vmatprep.subr.mxu0 %v956_v1  ;;  %786 = vmatprep.subr.mxu1 %v956_v1  ;;  %256 = vst.msk [vmem:[#allocation2] sm:$0x1] %vm255_vm0, %v956_v1  ;;  %257 = vst.msk [vmem:[#allocation3] sm:$0x1] %vm255_vm0, %v956_v1  ;;  %vm267_vm1 = vcmask 261120   ;;  %v327_v4 = vld [vmem:[%s1187_s3] sm:$0xff] }
  0x16   : > { %776 = vmatpush3.msra.mxu0 %v330_v0  ;;  %787 = vmatpush3.msra.mxu1 %v330_v0  ;;  %s754_s14 = sshll.u32 %s243_s11, 6  ;;  %vm957_vm2 = vmmov 0   ;;  %vm647_vm3 = vcmask 1040384   ;;  %vm649_vm4 = vcmask 254976   ;;  %s878_s11 = scalar_lea.vmem %s666_s29, 32 }
  0x17   : > { %777 = vmatprep.subr.mxu0 %v956_v1  ;;  %788 = vmatprep.subr.mxu1 %v956_v1  ;;  %s1071_s25 = scalar_lea.vmem %s1184_s0, %s754_s14  ;;  %p879_p12 = scmp.ne.s32.totalorder %s666_s29, %s878_s11 }
  0x18   : > { %778 = vmatpush3.msra.mxu0 %v329_v2  ;;  %789 = vmatpush3.msra.mxu1 %v329_v2  ;;  %v258_v5 = vld [vmem:[%s1071_s25] sm:$0xff]  ;;  %v259_v6 = vld [vmem:[%s1071_s25 + $0x8] sm:$0xff]  ;;  %v260_v7 = vld [vmem:[%s1071_s25 + $0x10] sm:$0xff] }
  0x19   : > { %779 = vmatprep.subr.mxu0 %v956_v1  ;;  %790 = vmatprep.subr.mxu1 %v956_v1  ;;  %v261_v8 = vld [vmem:[%s1071_s25 + $0x18] sm:$0xff]  ;;  %v268_v9 = vsel %vm267_vm1, %v258_v5, 0.0  ;;  %v269_v10 = vsel %vm267_vm1, %v259_v6, 0.0  ;;  %v271_v11 = vsel %vm267_vm1, %v260_v7, 0.0  ;;  %v293_v12 = vmul.f32 %v258_v5, %v258_v5  ;;  %v262_v13 = vld [vmem:[%s1071_s25 + $0x20] sm:$0xff]  ;;  %v263_v18 = vld [vmem:[%s1071_s25 + $0x28] sm:$0xff]  ;;  %p880_p13 = pnand %p879_p12, %p1029_p4 }
  0x1a   : > { %780 = vmatpush3.msra.mxu0 %v328_v3  ;;  %783 = vmatprep.mubr.msk.f32.mxu0 %vm957_vm2, %v956_v1  ;;  %v270_v14 = vadd.f32 %v269_v10, %v268_v9  ;;  %v273_v15 = vsel %vm267_vm1, %v261_v8, 0.0  ;;  %v294_v16 = vmul.f32 %v259_v6, %v259_v6  ;;  %v295_v17 = vmul.f32 %v260_v7, %v260_v7  ;;  %v264_v25 = vld [vmem:[%s1071_s25 + $0x30] sm:$0xff]  ;;  %v265_v32 = vld [vmem:[%s1071_s25 + $0x38] sm:$0xff]  ;;  %v486_v9 = vld [vmem:[%s1188_s4] sm:$0xff]  ;;  %s751_s25 = sshll.u32 %s946_s21, 5  ;;  %s958_s21 = smov [#allocation4]  }
  0x1b   : > { %781 = vmatprep.subr.mxu0 %v956_v1  ;;  %791 = vmatpush3.msra.mxu1 %v328_v3  ;;  %v296_v20 = vmul.f32 %v261_v8, %v261_v8  ;;  %v275_v21 = vsel %vm267_vm1, %v262_v13, 0.0  ;;  %v297_v22 = vmul.f32 %v262_v13, %v262_v13  ;;  %v301_v23 = vsel %vm267_vm1, %v293_v12, 0.0  ;;  %v488_v6 = vld [vmem:[%s1188_s4 + $0x10] sm:$0xff]  ;;  %v487_v8 = vld [vmem:[%s1188_s4 + $0x8] sm:$0xff]  ;;  %s1144_s9 = scalar_lea.hbm %s1189_s5, %s751_s25  ;;  %p881_p0 = pneg %p880_p13 }
  0x1c   : > { %782 = vmatpush3.msra.mxu0 %v327_v4  ;;  %792 = vmatprep.subr.mxu1 %v956_v1  ;;  %v272_v19 = vadd.f32 %v271_v11, %v270_v14  ;;  %v302_v24 = vsel %vm267_vm1, %v294_v16, 0.0  ;;  %v304_v28 = vsel %vm267_vm1, %v295_v17, 0.0  ;;  %v277_v29 = vsel %vm267_vm1, %v263_v18, 0.0  ;;  %v266_v59 = vld [vmem:[#allocation2] sm:$0x1]  ;;  %s882_s12 = sshll.u32 %s958_s21, 4  ;;  %s883_s12 = int_to_ptr.vmem [resolvable:$false] %s882_s12 }
  0x1d   : > { %793 = vmatpush3.msra.mxu1 %v327_v4  ;;  %794 = vmatprep.mubr.msk.f32.mxu1 %vm957_vm2, %v956_v1  ;;  %v303_v27 = vadd.f32 %v302_v24, %v301_v23  ;;  %v298_v30 = vmul.f32 %v263_v18, %v263_v18  ;;  %v306_v31 = vsel %vm267_vm1, %v296_v20, 0.0  ;;  %v279_v35 = vsel %vm267_vm1, %v264_v25, 0.0  ;;  %v292_v0 = vld [vmem:[#allocation3] sm:$0x1]  ;;  %v489_v4 = vld [vmem:[%s1188_s4 + $0x18] sm:$0xff]  ;;  %s884_s14 = scalar_lea.vmem %s883_s12, 64  ;;  %p885_p1 = scmp.lt.s32.totalorder %s666_s29, %s883_s12 }
  0x1e   : > { %797 = vmatprep.subr.mxu0 %v956_v1  ;;  %808 = vmatprep.subr.mxu1 %v956_v1  ;;  %v274_v26 = vadd.f32 %v273_v15, %v272_v19  ;;  %v299_v36 = vmul.f32 %v264_v25, %v264_v25  ;;  %v308_v37 = vsel %vm267_vm1, %v297_v22, 0.0  ;;  %v281_v40 = vsel %vm267_vm1, %v265_v32, 0.0  ;;  %v636_v23 = vld [vmem:[%s1185_s1] sm:$0x1]  ;;  %p886_p2 = scmp.lt.s32.totalorder %s884_s14, %s878_s11 }
  0x1f   : > { %v305_v34 = vadd.f32 %v304_v28, %v303_v27  ;;  %v300_v41 = vmul.f32 %v265_v32, %v265_v32  ;;  %v310_v42 = vsel %vm267_vm1, %v298_v30, 0.0  ;;  %v642_v22 = vlaneseq  ;;  %v638_v27 = vld [vmem:[%s1186_s2] sm:$0x1] }
  0x20   : > { %v276_v33 = vadd.f32 %v275_v21, %v274_v26  ;;  %v312_v45 = vsel %vm267_vm1, %v299_v36, 0.0  ;;  %p887_p3 = por %p886_p2, %p885_p1 }
  0x21   : > { %v307_v39 = vadd.f32 %v306_v31, %v305_v34  ;;  %v314_v48 = vsel %vm267_vm1, %v300_v41, 0.0  ;;  %v643_v24 = vshrl.u32 %v642_v22, 7 }
  0x22   : > { %v278_v38 = vadd.f32 %v277_v29, %v276_v33  ;;  %p888_p5 = pnand %p887_p3, %p881_p0 }
  0x23   : > { %v309_v44 = vadd.f32 %v308_v37, %v307_v39  ;;  %v644_v30 = vsub.s32 0, %v643_v24 }
  0x24   : > { %v280_v43 = vadd.f32 %v279_v35, %v278_v38 }
  0x25   : > { %v311_v47 = vadd.f32 %v310_v42, %v309_v44 }
  0x26   : > { %v282_v46 = vadd.f32 %v281_v40, %v280_v43 }
  0x27   : > { %v313_v50 = vadd.f32 %v312_v45, %v311_v47 }
  0x28   : > { %v283_v49 = vrot.slane %v282_v46, 4 }
  0x29   : > { %v315_v52 = vadd.f32 %v314_v48, %v313_v50 }
  0x2a   : > { %v284_v51 = vadd.f32 %v283_v49, %v282_v46 }
  0x2b   : > { %v316_v54 = vrot.slane %v315_v52, 4 }
  0x2c   : > { %v285_v53 = vrot.slane %v284_v51, 2 }
  0x2d   : > { %v317_v56 = vadd.f32 %v316_v54, %v315_v52 }
  0x2e   : > { %v286_v55 = vadd.f32 %v285_v53, %v284_v51 }
  0x2f   : > { %v318_v58 = vrot.slane %v317_v56, 2 }
  0x30   : > { %v287_v57 = vrot.slane %v286_v55, 1 }
  0x31   : > { %v319_v61 = vadd.f32 %v318_v58, %v317_v56 }
  0x32   : > { %v288_v60 = vadd.f32 %v287_v57, %v286_v55 }
  0x33   : > { %v320_v63 = vrot.slane %v319_v61, 1 }
  0x34   : > { %v289_v62 = vadd.f32 %v288_v60, %v266_v59 }
  0x35   : > { %v321_v2 = vadd.f32 %v320_v63, %v319_v61 }
  0x36   : > { %291 = vst.msk [vmem:[#allocation2] sm:$0x1] %vm255_vm0, %v289_v62 }
  0x37   : > { %v322_v3 = vadd.f32 %v321_v2, %v292_v0 }
  0x39   : > { %323 = vst.msk [vmem:[#allocation3] sm:$0x1] %vm255_vm0, %v322_v3 }
  0x3d   : > { %v331_v5 = vld [vmem:[#allocation2] sm:$0x1] }
  0x3e   : > { %784 = vmatmul.mubr.msk.f32.vlgmr.msra.gmra.mxu0 %vm267_vm1, %v331_v5 }
  0x3f   : > { %798 = vmatpush3.msra.mxu0 %v489_v4  ;;  %805 = vmatprep.mubr.msk.f32.mxu0 %vm957_vm2, %v956_v1 }
  0x40   : > { %799 = vmatprep.subr.mxu0 %v956_v1  ;;  %v406_v7 = vld [vmem:[#allocation3] sm:$0x1] }
  0x41   : > { %800 = vmatpush3.msra.mxu0 %v488_v6  ;;  %795 = vmatmul.mubr.msk.f32.vlgmr.msra.gmra.mxu1 %vm267_vm1, %v406_v7 }
  0x42   : > { %801 = vmatprep.subr.mxu0 %v956_v1  ;;  %809 = vmatpush3.msra.mxu1 %v489_v4 }
  0x43   : > { %816 = vmatprep.mubr.msk.f32.mxu1 %vm957_vm2, %v956_v1  ;;  %810 = vmatprep.subr.mxu1 %v956_v1 }
  0x44   : > { %811 = vmatpush3.msra.mxu1 %v488_v6  ;;  %802 = vmatpush3.msra.mxu0 %v487_v8 }
  0x45   : > { %812 = vmatprep.subr.mxu1 %v956_v1  ;;  %803 = vmatprep.subr.mxu0 %v956_v1 }
  0x46   : > { %813 = vmatpush3.msra.mxu1 %v487_v8  ;;  %804 = vmatpush3.msra.mxu0 %v486_v9 }
  0x47   : > { %814 = vmatprep.subr.mxu1 %v956_v1 }
  0x48   : > { %815 = vmatpush3.msra.mxu1 %v486_v9 }
  0xfe   : > { %v401_v10 = vpop.f32.mrf.mxu0 }
  0xff   : > { %v405_v11 = vmul.f32 0.015625, %v401_v10 }
 0x100   : > { %v785_v12 = vpop.f32.mrf.mxu0 }
 0x101   : > { %v481_v13 = vmul.f32 %v405_v11, %v405_v11  ;;  %806 = vmatmul.mubr.msk.f32.vlgmr.msra.gmra.mxu0 %vm267_vm1, %v405_v11  ;;  %v476_v14 = vpop.f32.mrf.mxu1 }
 0x102   : > { %v480_v15 = vmul.f32 0.015625, %v476_v14 }
 0x103   : > { %v796_v16 = vpop.f32.mrf.mxu1 }
 0x104   : > { %v482_v17 = vsub.f32 %v480_v15, %v481_v13 }
 0x106   : > { %v483_v18 = vmax.f32 %v482_v17, 0.0 }
 0x108   : > { %v484_v19 = vadd.f32 1e-05, %v483_v18 }
 0x10a   : > { %876 = vrsqrt.f32 %v484_v19 }
 0x117   : > { %v877_v20 = vpop.eup %876 }
 0x118   : > { %817 = vmatmul.mubr.msk.f32.vlgmr.msra.gmra.mxu1 %vm267_vm1, %v877_v20 }
 0x1c1   : > { %v559_v1 = vpop.f32.mrf.mxu0 }
 0x1c3   : > { %v807_v21 = vpop.f32.mrf.mxu0 }
 0x1d8   : > { %v632_v25 = vpop.f32.mrf.mxu1 }
 0x1d9   : > { %v637_v26 = vmul.f32 %v636_v23, %v632_v25 }
 0x1da   : > { %v818_v28 = vpop.f32.mrf.mxu1 }
 0x1db   : > { %v639_v29 = vmul.f32 %v637_v26, %v559_v1 }
 0x1dd   : > { %v640_v31 = vsub.f32 %v638_v27, %v639_v29 }
 0x1df   : > { %v645_v32 = vrot.slane %v640_v31, %v644_v30 }
 0x1e1   : > { %v648_v33 = vsel %vm647_vm3, %v637_v26, %v645_v32 }
 0x1e2   : > { %650 = vst.msk [vmem:[%s240_s27] sm:$0x3] %vm649_vm4, %v648_v33 }
 0x1e3   : > { %891 = shalt.err (!%p888_p5)
}
 0x1e4   : > { %s892_s15 = scalar_lea.hbm %s1144_s9, 32  ;;  %s896_s17 = scalar_lea.hbm %s1189_s5, 64 }
 0x1e5   : > { %p893_p6 = scmp.ne.s32.totalorder %s1144_s9, %s892_s15  ;;  %p897_p10 = scmp.lt.s32.totalorder %s1144_s9, %s1189_s5 }
 0x1e6   : > { %p898_p11 = scmp.lt.s32.totalorder %s896_s17, %s892_s15 }
 0x1e7   : > { %p894_p7 = pnand %p893_p6, %p1029_p4 }
 0x1e8   : > { %p899_p12 = por %p898_p11, %p897_p10 }
 0x1e9   : > { %p895_p9 = pneg %p894_p7 }
 0x1eb   : > { %p900_p13 = pnand %p899_p12, %p895_p9 }
 0x1ed   : > { %903 = shalt.err (!%p900_p13)
}
 0x1ee   : > { %819 = dma.vmem_to_hbm [thread:$0]  (%p1029_p4), %s666_s29, 32, %s1144_s9, %s652_s10  }
 0x1ef PF: > { %p825_p0 = scmp.ge.s32.totalorder %s954_s23, 2  ;;  %s677_s27 = sand.u32 1, %s934_s18  }
 0x1f0   : > { %s678_s7 = scalar_lea.sflag [#allocation5], %s677_s27 }
 0x1f1   : > { %p822_p1 = pnand %p825_p0, %p1036_p8 }
 0x1f3   : > { %p823_p2 = pneg %p822_p1 }
 0x1f5   : > { %929 = dma.done.wait (%p823_p2), %s678_s7, 32  }
 0x1f6   : > { %931 = vsyncadd (%p823_p2), %s678_s7, 4294967264  ;;  %s18_s23 = sadd.s32 1, %s954_s23   ;;  %s1192_s18 = smov %s938_s19 }
 0x1f7   : > { %p15_p3 = scmp.ge.s32.totalorder %s18_s23, 4   ;;  %s1193_s19 = smov %s942_s20 }
 0x1f8   : > { %s1194_s20 = smov %s1042_s6  ;;  %s1195_s21 = smov %s950_s22 }
 0x1f9   : > { %s1196_s22 = smov %s1198_s26  ;;  %17 = sbr.rel (!%p15_p3) target bundleno = 4 (0x4), region = 83 }
 0x1fe   :  { %683 = vsyncpa [#allocation5], 1 }
 0x1ff   :  { %685 = vsyncpa [#allocation5 + $0x1], 1 }

</bundles_post_ra>
